<compile_context>
chip_gen: v7x
topology: tpu7x:2x2x1
jax: 0.10.0
libtpu: 0.0.40
codegen_flags: <defaults>
</compile_context>

<pallas_src>
import functools

import jax
import jax.numpy as jnp
from jax.experimental import pallas as pl
from jax.experimental.pallas import tpu as pltpu

# ----------------------- module hyper-parameters / test shapes ---------------
GROUP_SIZE   = 2              # MinibatchStdLayer(group_size=2, num_channels=1)
NUM_CHANNELS = 1
N, C, H, W   = 4, 4, 16, 16   # batch of 4 -> two group slots of two
EPS          = 1e-8


def _make_mbstd_kernel(n, ch, hw, g, num_f):
    """Build the fused minibatch-std kernel for static shapes."""
    m = n // g                 # batches per group slot (torch reshape(G, -1, ...))
    cpf = ch // num_f          # channels per std feature

    def kernel(xg_ref, xf_ref, o_ref):
        # ---- group statistics in f32 on full (8,128) tiles -------------------
        # xg[gg, mm*ch + ci, :] == x[gg*m + mm, ci, :]  (pure reshape of NCHW)
        xg = xg_ref[...].astype(jnp.float32)              # (g, m*ch, hw)
        mu = jnp.mean(xg, axis=0, keepdims=True)          # (1, m*ch, hw) mean over group
        var = jnp.mean(jnp.square(xg - mu), axis=0)       # (m*ch, hw)    biased variance
        std = jnp.sqrt(var + EPS)                         # (m*ch, hw)

        # ---- per-(slot, feature) scalar -> one lane-dense stat slab ----------
        rows = []                                         # m rows of (1, F*hw)
        for mm in range(m):
            segs = []
            for ff in range(num_f):
                lo = mm * ch + ff * cpf
                blk = std[lo:lo + cpf, :]                 # (cpf, hw) == (c, H*W)
                segs.append(jnp.broadcast_to(jnp.mean(blk), (1, hw)))
            rows.append(segs[0] if num_f == 1 else jnp.concatenate(segs, axis=1))
        slab_m = rows[0] if m == 1 else jnp.concatenate(rows, axis=0)   # (m, F*hw)
        # batch nn gets slot nn % m  ==  vertical tiling of the (m, F*hw) block
        slab = slab_m if g == 1 else jnp.tile(slab_m, (g, 1))           # (n, F*hw)

        # ---- exactly two lane-aligned stores ----------------------------------
        o_ref[:, :ch * hw] = xf_ref[...]                  # passthrough channels
        o_ref[:, ch * hw:] = slab.astype(o_ref.dtype)     # std-stat channels

    return kernel


@functools.partial(jax.jit, static_argnums=(1, 2))
def minibatch_std(x, group_size=GROUP_SIZE, num_channels=NUM_CHANNELS):
    """x: NCHW [N, C, H, W] -> [N, C + num_channels, H, W]."""
    n, ch, h, w = x.shape
    g = min(group_size, n) if group_size is not None else n
    assert n % g == 0, "batch must be divisible by group size"
    assert ch % num_channels == 0, "channels must be divisible by num_channels"
    m = n // g
    hw = h * w
    nf = num_channels

    # Two views of the SAME contiguous NCHW buffer (pure reshapes, no transpose):
    x_grp  = x.reshape(g, m * ch, hw)   # group-major fold: full-tile stats compute
    x_flat = x.reshape(n, ch * hw)      # lane-dense fold: one wide passthrough store

    itemsize = jnp.dtype(x.dtype).itemsize
    cost = pl.CostEstimate(
        flops=6 * n * ch * hw,                                   # sub/sq/means/eps-add
        transcendentals=m * ch * hw,                             # sqrt count
        bytes_accessed=(2 * n * ch * hw + n * (ch + nf) * hw) * itemsize,
    )

    out_flat = pl.pallas_call(
        _make_mbstd_kernel(n, ch, hw, g, nf),
        out_shape=jax.ShapeDtypeStruct((n, (ch + nf) * hw), x.dtype),
        in_specs=[pl.BlockSpec(memory_space=pltpu.MemorySpace.VMEM),
                  pl.BlockSpec(memory_space=pltpu.MemorySpace.VMEM)],
        out_specs=pl.BlockSpec(memory_space=pltpu.MemorySpace.VMEM),
        cost_estimate=cost,
    )(x_grp, x_flat)

    return out_flat.reshape(n, ch + nf, h, w)


# ----------------------------- pure-JAX reference ----------------------------
def minibatch_std_reference(x, group_size, num_channels):
    n, ch, h, w = x.shape
    g = min(group_size, n) if group_size is not None else n
    f = num_channels
    c = ch // f
    y = x.reshape(g, -1, f, c, h, w)
    y = y - jnp.mean(y, axis=0)
    y = jnp.mean(jnp.square(y), axis=0)
    y = jnp.sqrt(y + EPS)
    y = jnp.mean(y, axis=(2, 3, 4))            # (M, F)
    y = y.reshape(-1, f, 1, 1)
    y = jnp.tile(y, (g, 1, h, w))              # (N, F, H, W); batch n -> stat[n % M]
    return jnp.concatenate([x, y], axis=1)


# ----------------------------------- main ------------------------------------
if __name__ == "__main__":
    key = jax.random.PRNGKey(0)
    x = jax.random.normal(key, (N, C, H, W), jnp.float32)

    y = jax.block_until_ready(minibatch_std(x, GROUP_SIZE, NUM_CHANNELS))
    y_ref = minibatch_std_reference(x, GROUP_SIZE, NUM_CHANNELS)

    assert y.shape == (N, C + NUM_CHANNELS, H, W)
    err = float(jnp.max(jnp.abs(y - y_ref)))
    assert jnp.allclose(y, y_ref, atol=1e-5, rtol=1e-5), err
    print("KERNEL_OK")
</pallas_src>

<mosaic_0001>
module attributes {stable_mosaic.version = 11 : i64} {
  func.func @kernel(%arg0: memref<2x8x256xf32, #tpu.memory_space<vmem>>, %arg1: memref<4x1024xf32, #tpu.memory_space<vmem>>, %arg2: memref<4x1280xf32, #tpu.memory_space<vmem>>) attributes {dimension_semantics = [], scalar_prefetch = 0 : i64, scratch_operands = 0 : i64, tpu.core_type = #tpu.core_type<tc>} {
    %c0 = arith.constant 0 : index
    %c0_0 = arith.constant 0 : index
    %c0_1 = arith.constant 0 : index
    %0 = vector.load %arg0[%c0, %c0_0, %c0_1] : memref<2x8x256xf32, #tpu.memory_space<vmem>>, vector<2x8x256xf32>
    %cst = arith.constant dense<0.000000e+00> : vector<8x256xf32>
    %1 = vector.multi_reduction <add>, %0, %cst [0] : vector<2x8x256xf32> to vector<8x256xf32>
    %2 = vector.shape_cast %1 : vector<8x256xf32> to vector<1x8x256xf32>
    %cst_2 = arith.constant 2.000000e+00 : f32
    %3 = vector.broadcast %cst_2 : f32 to vector<1x8x256xf32>
    %4 = arith.divf %2, %3 : vector<1x8x256xf32>
    %5 = vector.broadcast %4 : vector<1x8x256xf32> to vector<2x8x256xf32>
    %6 = arith.subf %0, %5 : vector<2x8x256xf32>
    %7 = arith.mulf %6, %6 : vector<2x8x256xf32>
    %cst_3 = arith.constant dense<0.000000e+00> : vector<8x256xf32>
    %8 = vector.multi_reduction <add>, %7, %cst_3 [0] : vector<2x8x256xf32> to vector<8x256xf32>
    %cst_4 = arith.constant 2.000000e+00 : f32
    %9 = vector.broadcast %cst_4 : f32 to vector<8x256xf32>
    %10 = arith.divf %8, %9 : vector<8x256xf32>
    %cst_5 = arith.constant 9.99999993E-9 : f32
    %11 = vector.broadcast %cst_5 : f32 to vector<8x256xf32>
    %12 = arith.addf %10, %11 : vector<8x256xf32>
    %13 = math.sqrt %12 : vector<8x256xf32>
    %14 = vector.extract_strided_slice %13 {offsets = [0, 0], sizes = [4, 256], strides = [1, 1]} : vector<8x256xf32> to vector<4x256xf32>
    %15 = vector.shape_cast %14 : vector<4x256xf32> to vector<1x4x256xf32>
    %cst_6 = arith.constant dense<0.000000e+00> : vector<1xf32>
    %16 = vector.multi_reduction <add>, %15, %cst_6 [1, 2] : vector<1x4x256xf32> to vector<1xf32>
    %17 = vector.shape_cast %16 : vector<1xf32> to vector<1x1x1xf32>
    %18 = vector.extract %17[0, 0, 0] : f32 from vector<1x1x1xf32>
    %cst_7 = arith.constant 1.024000e+03 : f32
    %19 = arith.divf %18, %cst_7 : f32
    %20 = vector.broadcast %19 : f32 to vector<1x256xf32>
    %21 = vector.extract_strided_slice %13 {offsets = [4, 0], sizes = [4, 256], strides = [1, 1]} : vector<8x256xf32> to vector<4x256xf32>
    %22 = vector.shape_cast %21 : vector<4x256xf32> to vector<1x4x256xf32>
    %cst_8 = arith.constant dense<0.000000e+00> : vector<1xf32>
    %23 = vector.multi_reduction <add>, %22, %cst_8 [1, 2] : vector<1x4x256xf32> to vector<1xf32>
    %24 = vector.shape_cast %23 : vector<1xf32> to vector<1x1x1xf32>
    %25 = vector.extract %24[0, 0, 0] : f32 from vector<1x1x1xf32>
    %cst_9 = arith.constant 1.024000e+03 : f32
    %26 = arith.divf %25, %cst_9 : f32
    %27 = vector.broadcast %26 : f32 to vector<1x256xf32>
    %28 = tpu.concatenate %20, %27 in 0 : vector<1x256xf32>, vector<1x256xf32> -> vector<2x256xf32>
    %29 = tpu.concatenate %28, %28 in 0 : vector<2x256xf32>, vector<2x256xf32> -> vector<4x256xf32>
    %c0_10 = arith.constant 0 : index
    %c0_11 = arith.constant 0 : index
    %30 = vector.load %arg1[%c0_10, %c0_11] : memref<4x1024xf32, #tpu.memory_space<vmem>>, vector<4x1024xf32>
    %c0_12 = arith.constant 0 : index
    %c0_13 = arith.constant 0 : index
    %31 = vector.load %arg2[%c0_12, %c0_13] : memref<4x1280xf32, #tpu.memory_space<vmem>>, vector<4x1024xf32>
    tpu.vector_store %arg2[%c0_12, %c0_13], %30 {strides = array<i32>} : memref<4x1280xf32, #tpu.memory_space<vmem>>, vector<4x1024xf32>,
    %c0_14 = arith.constant 0 : index
    %c1024 = arith.constant 1024 : index
    %32 = vector.load %arg2[%c0_14, %c1024] : memref<4x1280xf32, #tpu.memory_space<vmem>>, vector<4x256xf32>
    tpu.vector_store %arg2[%c0_14, %c1024], %29 {strides = array<i32>} : memref<4x1280xf32, #tpu.memory_space<vmem>>, vector<4x256xf32>,
    return
  }
}

</mosaic_0001>

<bundles_post_ra>
// kernel: minibatch_std.1
= control target key start
LH: loop header
LB: loop body
LE: loop exit
PB: predicated region body
PF: predicated region fallthrough
CT: control target
= control target key end

     0   :  { %vm48_vm4 = vcmask 1043456   ;;  %vm87_vm5 = vcmask 1040384   ;;  %vm92_vm6 = vcmask 1041408   ;;  %s172_s0 = inlined_call_operand.vmem [shape: f32[2,8,256], index: 0, kind: input, shape index: {}]   ;;  %s173_s1 = inlined_call_operand.vmem [shape: f32[4,1024], index: 1, kind: input, shape index: {}]   ;;  %s174_s2 = inlined_call_operand.vmem [shape: f32[4,1280], index: 2, kind: output, shape index: {}]  }
   0x1   :  { %v11_v0 = vld [vmem:[%s172_s0] sm:$0xff]  ;;  %v12_v1 = vld [vmem:[%s172_s0 + $0x8] sm:$0xff]  ;;  %v13_v2 = vld [vmem:[%s172_s0 + $0x10] sm:$0xff] }
   0x2   :  { %v14_v3 = vld [vmem:[%s172_s0 + $0x18] sm:$0xff]  ;;  %v15_v4 = vadd.f32 %v13_v2, %v11_v0  ;;  %v94_v40 = vld [vmem:[%s173_s1] sm:$0xff]  ;;  %v95_v41 = vld [vmem:[%s173_s1 + $0x8] sm:$0xff] }
   0x3   :  { %v16_v5 = vadd.f32 %v14_v3, %v12_v1  ;;  %v96_v42 = vld [vmem:[%s173_s1 + $0x10] sm:$0xff]  ;;  %v97_v43 = vld [vmem:[%s173_s1 + $0x18] sm:$0xff]  ;;  %98 = vst [vmem:[%s174_s2] sm:$0xff] %v94_v40  ;;  %99 = vst [vmem:[%s174_s2 + $0x8] sm:$0xff] %v95_v41 }
   0x4   :  { %v18_v6 = vmul.f32 0.5, %v15_v4  ;;  %100 = vst [vmem:[%s174_s2 + $0x10] sm:$0xff] %v96_v42  ;;  %101 = vst [vmem:[%s174_s2 + $0x18] sm:$0xff] %v97_v43 }
   0x5   :  { %v19_v7 = vmul.f32 0.5, %v16_v5 }
   0x6   :  { %v20_v8 = vsub.f32 %v11_v0, %v18_v6  ;;  %v22_v9 = vsub.f32 %v13_v2, %v18_v6 }
   0x7   :  { %v21_v10 = vsub.f32 %v12_v1, %v19_v7  ;;  %v23_v11 = vsub.f32 %v14_v3, %v19_v7 }
   0x8   :  { %v24_v12 = vmul.f32 %v20_v8, %v20_v8  ;;  %v26_v13 = vmul.f32 %v22_v9, %v22_v9 }
   0x9   :  { %v25_v14 = vmul.f32 %v21_v10, %v21_v10  ;;  %v27_v15 = vmul.f32 %v23_v11, %v23_v11 }
   0xa   :  { %v28_v16 = vadd.f32 %v26_v13, %v24_v12 }
   0xb   :  { %v29_v17 = vadd.f32 %v27_v15, %v25_v14 }
   0xc   :  { %v30_v18 = vmul.f32 0.5, %v28_v16 }
   0xd   :  { %v31_v19 = vmul.f32 0.5, %v29_v17 }
   0xe   :  { %v32_v20 = vadd.f32 1e-08, %v30_v18 }
   0xf   :  { %v33_v21 = vadd.f32 1e-08, %v31_v19 }
  0x10   :  { %114 = vrsqrt.f32 %v32_v20  ;;  %vm36_vm0 = vcmp.eq.f32.partialorder %v32_v20, inf  ;;  %v39_v23 = vand.u32 2147483648, %v32_v20  ;;  %vm38_vm1 = vcmp.eq.f32.partialorder %v32_v20, 0.0 }
  0x11   :  { %116 = vrsqrt.f32 %v33_v21  ;;  %vm43_vm2 = vcmp.eq.f32.partialorder %v33_v21, inf  ;;  %v46_v26 = vand.u32 2147483648, %v33_v21  ;;  %vm45_vm3 = vcmp.eq.f32.partialorder %v33_v21, 0.0 }
  0x1a   :  { %v115_v22 = vpop.eup %114 }
  0x1b   :  { %v117_v24 = vpop.eup %116  ;;  %v35_v25 = vmul.f32 %v115_v22, %v32_v20 }
  0x1c   :  { %v42_v27 = vmul.f32 %v117_v24, %v33_v21 }
  0x1d   :  { %v37_v28 = vsel %vm36_vm0, %v32_v20, %v35_v25 }
  0x1e   :  { %v40_v29 = vsel %vm38_vm1, %v39_v23, %v37_v28  ;;  %v44_v30 = vsel %vm43_vm2, %v33_v21, %v42_v27 }
  0x1f   :  { %v47_v31 = vsel %vm45_vm3, %v46_v26, %v44_v30  ;;  %v49_v32 = vsel %vm48_vm4, %v40_v29, 0.0  ;;  %v67_v33 = vrot.slane %v40_v29, 4 }
  0x20   :  { %v50_v34 = vsel %vm48_vm4, %v47_v31, 0.0  ;;  %v68_v35 = vrot.slane %v47_v31, 4 }
  0x21   :  { %v51_v36 = vadd.f32 %v50_v34, %v49_v32  ;;  %v71_v37 = vsel %vm48_vm4, %v67_v33, 0.0 }
  0x22   :  { %v72_v38 = vsel %vm48_vm4, %v68_v35, 0.0 }
  0x23   :  { %52 = vadd.xlane.f32.xlu0 %v51_v36  ;;  %v73_v39 = vadd.f32 %v72_v38, %v71_v37 }
  0x27   :  { %74 = vadd.xlane.f32.xlu0 %v73_v39 }
  0xb0   :  { %v53_v44 = vpop.xlane.xlu0 %52 }
  0xb1   :  { %v54_v45 = vrot.slane %v53_v44, 4 }
  0xb3   :  { %v55_v46 = vadd.f32 %v54_v45, %v53_v44 }
  0xb4   :  { %v75_v47 = vpop.xlane.xlu0 %74 }
  0xb5   :  { %v56_v48 = vrot.slane %v55_v46, 2  ;;  %v76_v49 = vrot.slane %v75_v47, 4 }
  0xb7   :  { %v77_v50 = vadd.f32 %v76_v49, %v75_v47  ;;  %v57_v51 = vadd.f32 %v56_v48, %v55_v46 }
  0xb9   :  { %v78_v52 = vrot.slane %v77_v50, 2  ;;  %v58_v53 = vrot.slane %v57_v51, 1 }
  0xbb   :  { %v79_v54 = vadd.f32 %v78_v52, %v77_v50  ;;  %v59_v55 = vadd.f32 %v58_v53, %v57_v51 }
  0xbd   :  { %110 = vpush %v59_v55  ;;  %v80_v56 = vrot.slane %v79_v54, 1 }
  0xbf   :  { %v81_v57 = vadd.f32 %v80_v56, %v79_v54 }
  0xc1   :  { %112 = vpush %v81_v57 }
  0xee   :  { %s111_s1 = spop %110 }
  0xef   :  { %s63_s4 = smul.f32 0.0009765625, %s111_s1 }
  0xf1   :  { %v64_v58 = vstv %s63_s4 }
  0xf2   :  { %s113_s5 = spop %112 }
  0xf3   :  { %s85_s6 = smul.f32 0.0009765625, %s113_s5 }
  0xf5   :  { %v86_v59 = vstv %s85_s6 }
  0xf6   :  { %v88_v60 = vsel %vm87_vm5, %v64_v58, %v86_v59 }
  0xf7   :  { %v90_v61 = vrot.slane %v88_v60, 6 }
  0xf9   :  { %v93_v62 = vsel %vm92_vm6, %v88_v60, %v90_v61 }
  0xfa   :  { %v103_v63 = vcombine.low %v93_v62, %v93_v62 }
  0xfc   :  { %105 = vst [vmem:[%s174_s2 + $0x20] sm:$0xff] %v103_v63 }

</bundles_post_ra>
